<compile_context>
chip_gen: v7x
topology: tpu7x:2x2x1
jax: 0.10.0
libtpu: 0.0.40
codegen_flags: <defaults>
</compile_context>

<pallas_src>
import functools

import numpy as np

import jax
import jax.numpy as jnp
from jax.experimental import pallas as pl
from jax.experimental.pallas import tpu as pltpu


# ------------------------------ Pallas kernels ------------------------------

def dense_collapsed_kernel(x_ref, w_ref, b_ref, o_ref):
    # Collapsed affine map: o = x @ W_eff + b_eff
    # x is f32 in HBM; cast to the weight dtype (bf16) in-kernel for the MXU,
    # accumulate and add the bias in f32.
    x = x_ref[...].astype(w_ref.dtype)
    o_ref[...] = (
        jnp.dot(x, w_ref[...], preferred_element_type=jnp.float32)
        + b_ref[...]
    )


def dense_fused_kernel(x_ref, w1_ref, b1_ref, w2_ref, b2_ref, o_ref):
    # Structure-preserving fused Dense block:
    #   linear1 -> dropout(identity, eval mode) -> linear2
    # fused in one kernel so the hidden activation never leaves VMEM.
    x = x_ref[...].astype(w1_ref.dtype)
    h = (
        jnp.dot(x, w1_ref[...], preferred_element_type=jnp.float32)
        + b1_ref[...]
    )
    o_ref[...] = (
        jnp.dot(h.astype(w2_ref.dtype), w2_ref[...],
                preferred_element_type=jnp.float32)
        + b2_ref[...]
    )


# ----------------------------- kernel wrappers -------------------------------

_PARALLEL_ROWS = pltpu.CompilerParams(dimension_semantics=("parallel",))


def _row_tile(n_rows, max_tile_rows):
    # Full-array block when everything fits; otherwise an 8-aligned row tile
    # (the (8,128) tiling rule applies to the second-to-last block dim; a
    # block equal to the full array extent is always legal).
    if n_rows <= max_tile_rows:
        return n_rows
    tile = max_tile_rows - (max_tile_rows % 8)
    return max(tile, 8)


def pallas_dense_collapsed(x2d, w_eff, b_eff, *, max_tile_rows=512):
    n, din = x2d.shape
    dout = w_eff.shape[1]
    tm = _row_tile(n, max_tile_rows)
    return pl.pallas_call(
        dense_collapsed_kernel,
        out_shape=jax.ShapeDtypeStruct((n, dout), jnp.float32),
        grid_spec=pltpu.PrefetchScalarGridSpec(
            num_scalar_prefetch=0,
            grid=(pl.cdiv(n, tm),),
            in_specs=[
                pl.BlockSpec((tm, din), lambda i: (i, 0)),     # row-tiled x (f32)
                pl.BlockSpec((din, dout), lambda i: (0, 0)),   # resident W_eff (bf16)
                pl.BlockSpec((1, dout), lambda i: (0, 0)),     # resident b_eff (f32)
            ],
            out_specs=pl.BlockSpec((tm, dout), lambda i: (i, 0)),
        ),
        compiler_params=_PARALLEL_ROWS,
    )(x2d, w_eff, b_eff)


def pallas_dense_fused(x2d, w1, b1, w2, b2, *, max_tile_rows=512):
    n, din = x2d.shape
    dout = w2.shape[1]
    tm = _row_tile(n, max_tile_rows)
    return pl.pallas_call(
        dense_fused_kernel,
        out_shape=jax.ShapeDtypeStruct((n, dout), jnp.float32),
        grid_spec=pltpu.PrefetchScalarGridSpec(
            num_scalar_prefetch=0,
            grid=(pl.cdiv(n, tm),),
            in_specs=[
                pl.BlockSpec((tm, din), lambda i: (i, 0)),     # row-tiled x (f32)
                pl.BlockSpec((din, din), lambda i: (0, 0)),    # resident W1 (bf16)
                pl.BlockSpec((1, din), lambda i: (0, 0)),      # resident b1 (f32)
                pl.BlockSpec((din, dout), lambda i: (0, 0)),   # resident W2 (bf16)
                pl.BlockSpec((1, dout), lambda i: (0, 0)),     # resident b2 (f32)
            ],
            out_specs=pl.BlockSpec((tm, dout), lambda i: (i, 0)),
        ),
        compiler_params=_PARALLEL_ROWS,
    )(x2d, w1, b1, w2, b2)


# ----------------------------- parameters / forward --------------------------

def init_dense_params(key, in_dim, out_dim, compute_dtype=jnp.bfloat16):
    """PyTorch nn.Linear-style init; weights stored pre-transposed [in, out]."""
    k1, k2, k3, k4 = jax.random.split(key, 4)
    bound = 1.0 / np.sqrt(in_dim)
    w1 = jax.random.uniform(k1, (in_dim, in_dim), jnp.float32, -bound, bound)
    b1 = jax.random.uniform(k2, (1, in_dim), jnp.float32, -bound, bound)
    w2 = jax.random.uniform(k3, (in_dim, out_dim), jnp.float32, -bound, bound)
    b2 = jax.random.uniform(k4, (1, out_dim), jnp.float32, -bound, bound)
    # Algebraic collapse (dropout is identity in eval mode -> block is affine).
    w_eff = (w1 @ w2).astype(compute_dtype)
    b_eff = (b1 @ w2 + b2).astype(jnp.float32)
    return {
        # Structure-preserving parameters (compute dtype for the MXU).
        "w1": w1.astype(compute_dtype), "b1": b1,
        "w2": w2.astype(compute_dtype), "b2": b2,
        # Collapsed parameters (primary runtime path).
        "w_eff": w_eff, "b_eff": b_eff,
    }


@functools.partial(jax.jit, static_argnames=("collapse",))
def dense_forward(params, x, *, collapse=True):
    """x: [..., in_dim] -> [..., out_dim] (f32 output)."""
    in_dim = params["w1"].shape[0]
    out_dim = params["w2"].shape[1]
    lead = x.shape[:-1]
    x2d = x.reshape(-1, in_dim)          # f32; cast to bf16 happens in-kernel
    if collapse:
        y2d = pallas_dense_collapsed(x2d, params["w_eff"], params["b_eff"])
    else:
        y2d = pallas_dense_fused(
            x2d, params["w1"], params["b1"], params["w2"], params["b2"])
    return y2d.reshape(*lead, out_dim)


# ----------------------------------- main -------------------------------------

if __name__ == "__main__":
    # Small shapes consistent with the module; out_dim picked as a multiple of
    # 128 so the output store is lane-dense (unmasked vst).
    BATCH, SEQ = 2, 8
    IN_DIM, OUT_DIM = 32, 128

    key = jax.random.PRNGKey(0)
    kp, kx = jax.random.split(key)
    params = init_dense_params(kp, IN_DIM, OUT_DIM)
    x = jax.random.normal(kx, (BATCH, SEQ, IN_DIM), jnp.float32)

    # Primary (perf-optimized, collapsed) path.
    out = jax.block_until_ready(dense_forward(params, x, collapse=True))
    assert out.shape == (BATCH, SEQ, OUT_DIM), out.shape

    # Structure-preserving fused two-matmul path.
    out_fused = jax.block_until_ready(dense_forward(params, x, collapse=False))
    assert out_fused.shape == (BATCH, SEQ, OUT_DIM), out_fused.shape

    # References with identical bf16-operand / f32-accumulate numerics.
    xb = x.reshape(-1, IN_DIM).astype(jnp.bfloat16)
    ref_c = (
        jnp.dot(xb, params["w_eff"], preferred_element_type=jnp.float32)
        + params["b_eff"]
    ).reshape(BATCH, SEQ, OUT_DIM)
    h = (
        jnp.dot(xb, params["w1"], preferred_element_type=jnp.float32)
        + params["b1"]
    )
    ref_f = (
        jnp.dot(h.astype(jnp.bfloat16), params["w2"],
                preferred_element_type=jnp.float32)
        + params["b2"]
    ).reshape(BATCH, SEQ, OUT_DIM)

    np.testing.assert_allclose(np.asarray(out), np.asarray(ref_c),
                               rtol=1e-3, atol=1e-3)
    np.testing.assert_allclose(np.asarray(out_fused), np.asarray(ref_f),
                               rtol=1e-3, atol=1e-3)

    print("KERNEL_OK")
</pallas_src>

<mosaic_0001>
module attributes {stable_mosaic.version = 11 : i64} {
  func.func @dense_collapsed_kernel(%arg0: i32, %arg1: memref<16x32xf32, #tpu.memory_space<vmem>>, %arg2: memref<32x128xbf16, #tpu.memory_space<vmem>>, %arg3: memref<1x128xf32, #tpu.memory_space<vmem>>, %arg4: memref<16x128xf32, #tpu.memory_space<vmem>>) attributes {dimension_semantics = [#tpu.dimension_semantics<parallel>], iteration_bounds = array<i64: 1>, scalar_prefetch = 0 : i64, scratch_operands = 0 : i64, tpu.core_type = #tpu.core_type<tc>, window_params = [{transform_indices = @transform_0, window_bounds = array<i64: 16, 32>}, {pipeline_mode = #tpu.pipeline_mode<synchronous>, transform_indices = @transform_1, window_bounds = array<i64: 32, 128>}, {pipeline_mode = #tpu.pipeline_mode<synchronous>, transform_indices = @transform_2, window_bounds = array<i64: 1, 128>}, {transform_indices = @transform_3, window_bounds = array<i64: 16, 128>}]} {
    %c0 = arith.constant 0 : index
    %c0_0 = arith.constant 0 : index
    %0 = vector.load %arg1[%c0, %c0_0] : memref<16x32xf32, #tpu.memory_space<vmem>>, vector<16x32xf32>
    %1 = arith.truncf %0 : vector<16x32xf32> to vector<16x32xbf16>
    %c0_1 = arith.constant 0 : index
    %c0_2 = arith.constant 0 : index
    %2 = vector.load %arg2[%c0_1, %c0_2] : memref<32x128xbf16, #tpu.memory_space<vmem>>, vector<32x128xbf16>
    %cst = arith.constant dense<0.000000e+00> : vector<16x128xf32>
    %3 = tpu.matmul %1, %2, %cst {dimension_numbers = #tpu.dot_dimension_numbers<[1], [0], [0], [1], [0, 0, 1, 1], [], []>} : vector<16x32xbf16>, vector<32x128xbf16>, vector<16x128xf32> -> vector<16x128xf32>
    %c0_3 = arith.constant 0 : index
    %c0_4 = arith.constant 0 : index
    %4 = vector.load %arg3[%c0_3, %c0_4] : memref<1x128xf32, #tpu.memory_space<vmem>>, vector<1x128xf32>
    %5 = vector.broadcast %4 : vector<1x128xf32> to vector<16x128xf32>
    %6 = arith.addf %3, %5 : vector<16x128xf32>
    %c0_5 = arith.constant 0 : index
    %c0_6 = arith.constant 0 : index
    %7 = vector.load %arg4[%c0_5, %c0_6] : memref<16x128xf32, #tpu.memory_space<vmem>>, vector<16x128xf32>
    tpu.vector_store %arg4[%c0_5, %c0_6], %6 {strides = array<i32>} : memref<16x128xf32, #tpu.memory_space<vmem>>, vector<16x128xf32>,
    return
  }
  func.func @transform_0(%arg0: i32) -> (i32, i32) {
    %c0_i32 = arith.constant 0 : i32
    %c0_i32_0 = arith.constant 0 : i32
    return %arg0, %c0_i32 : i32, i32
  }
  func.func @transform_1(%arg0: i32) -> (i32, i32) {
    %c0_i32 = arith.constant 0 : i32
    %c0_i32_0 = arith.constant 0 : i32
    %c0_i32_1 = arith.constant 0 : i32
    return %c0_i32, %c0_i32_0 : i32, i32
  }
  func.func @transform_2(%arg0: i32) -> (i32, i32) {
    %c0_i32 = arith.constant 0 : i32
    %c0_i32_0 = arith.constant 0 : i32
    %c0_i32_1 = arith.constant 0 : i32
    return %c0_i32, %c0_i32_0 : i32, i32
  }
  func.func @transform_3(%arg0: i32) -> (i32, i32) {
    %c0_i32 = arith.constant 0 : i32
    %c0_i32_0 = arith.constant 0 : i32
    return %arg0, %c0_i32 : i32, i32
  }
}

</mosaic_0001>

<bundles_post_ra>
// kernel: dense_forward.1
= control target key start
LH: loop header
LB: loop body
LE: loop exit
PB: predicated region body
PF: predicated region fallthrough
CT: control target
= control target key end

     0   :  { %8 = vsyncpa [#allocation3], 0  ;;  %s307_s0 = inlined_call_operand.hbm [shape: f32[16,32], index: 0, kind: input, shape index: {}]   ;;  %s308_s1 = inlined_call_operand.hbm [shape: bf16[32,128], index: 1, kind: input, shape index: {}]   ;;  %s309_s2 = inlined_call_operand.vmem [shape: f32[1,128], index: 2, kind: input, shape index: {}]   ;;  %s310_s3 = inlined_call_operand.hbm [shape: f32[16,128], index: 3, kind: output, shape index: {}]  }
   0x1   :  { %9 = vsyncpa [#allocation6], 0 }
   0x2   :  { %10 = vsyncpa [#allocation4], 0  ;;  %s233_s12 = smov [#allocation2]   ;;  %s161_s16 = scalar_lea.hbm %s307_s0, 256 }
   0x3   :  { %s16_s13 = sshll.u32 %s233_s12, 4  ;;  %p162_p0 = scmp.ne.s32.totalorder %s307_s0, %s161_s16  ;;  %s17_s13 = int_to_ptr.vmem [resolvable:$true] %s16_s13 }
   0x4   :  { %p165_p1 = scmp.lt.u32.totalorder %s161_s16, %s307_s0 }
   0x6   :  { %p167_p2 = pnand %p165_p1, %p162_p0 }
   0x8   :  { %170 = shalt.err (!%p167_p2)
}
   0x9   :  { %s171_s21 = scalar_lea.vmem %s17_s13, 256  ;;  %p176_p4 = scmp.lt.s32.totalorder %s17_s13, %s17_s13 }
   0xa   :  { %p172_p3 = scmp.ne.s32.totalorder %s17_s13, %s171_s21  ;;  %p177_p5 = scmp.lt.s32.totalorder %s171_s21, %s171_s21 }
   0xc   :  { %p178_p6 = por %p177_p5, %p176_p4 }
   0xe   :  { %p179_p7 = pnand %p178_p6, %p172_p3 }
  0x10   :  { %182 = shalt.err (!%p179_p7)
}
  0x11   :  { %s234_s22 = smov 128   ;;  %s235_s23 = smov 8  }
  0x12   :  { %22 = dma.hbm_to_vmem [thread:$0]  %s307_s0, 256, %s17_s13, [#allocation3], %s234_s22, %s234_s22, %s235_s23  }
  0x13   :  { %s236_s26 = smov [#allocation5]   ;;  %s183_s30 = scalar_lea.hbm %s308_s1, 256 }
  0x14   :  { %s28_s27 = sshll.u32 %s236_s26, 4  ;;  %p184_p8 = scmp.ne.s32.totalorder %s308_s1, %s183_s30  ;;  %s29_s27 = int_to_ptr.vmem [resolvable:$true] %s28_s27 }
  0x15   :  { %p187_p9 = scmp.lt.u32.totalorder %s183_s30, %s308_s1 }
  0x17   :  { %p189_p10 = pnand %p187_p9, %p184_p8 }
  0x19   :  { %192 = shalt.err (!%p189_p10)
}
  0x1a   :  { %s193_s8 = scalar_lea.vmem %s29_s27, 256  ;;  %p198_p12 = scmp.lt.s32.totalorder %s29_s27, %s29_s27 }
  0x1b   :  { %p194_p11 = scmp.ne.s32.totalorder %s29_s27, %s193_s8  ;;  %p199_p13 = scmp.lt.s32.totalorder %s193_s8, %s193_s8 }
  0x1d   :  { %p200_p0 = por %p199_p13, %p198_p12 }
  0x1f   :  { %p201_p1 = pnand %p200_p0, %p194_p11 }
  0x21   :  { %204 = shalt.err (!%p201_p1)
}
  0x22   :  { %s237_s0 = smov 64   ;;  %s238_s9 = smov 4  }
  0x23   :  { %34 = dma.hbm_to_vmem [thread:$0]  %s308_s1, 256, %s29_s27, [#allocation6], %s237_s0, %s237_s0, %s238_s9  }
  0x24   :  { %227 = dma.done.wait [#allocation3], 256  }
  0x25   :  { %228 = vsyncadd [#allocation3], 4294967040 }
  0x26   :  { %229 = dma.done.wait [#allocation6], 256  }
  0x27   :  { %230 = vsyncadd [#allocation6], 4294967040  ;;  %v239_v0 = vmov 0.0   ;;  %vm240_vm0 = vmmov 0   ;;  %v159_v1 = vld [vmem:[#allocation5] sm:$0xff]   ;;  %v160_v2 = vld [vmem:[#allocation5 + $0x8] sm:$0xff]  }
  0x28   :  { %142 = vmatprep.subr.bf16.mxu0 %v239_v0  ;;  %146 = vmatprep.mubr.msk.bf16.mxu0 %vm240_vm0, %v239_v0  ;;  %v44_v3 = vld [vmem:[#allocation2] sm:$0xff]  ;;  %v45_v4 = vld [vmem:[#allocation2 + $0x8] sm:$0xff]  ;;  %vm70_vm1 = vcmask 261120   ;;  %s241_s13 = smov [#allocation7]  }
  0x29   :  { %143 = vmatpush3.bf16.msra.mxu0 %v159_v1  ;;  %v46_v5 = vpack.c.bf16 %v45_v4, %v44_v3  ;;  %v135_v6 = vld [vmem:[%s309_s2] ss:$0 sm:$0xff]  ;;  %s122_s14 = sshll.u32 %s241_s13, 4  ;;  %s123_s14 = int_to_ptr.vmem [resolvable:$true] %s122_s14 }
  0x2a   :  { %144 = vmatprep.subr.bf16.mxu0 %v239_v0  ;;  %s205_s15 = scalar_lea.vmem %s123_s14, 256  ;;  %p210_p3 = scmp.lt.s32.totalorder %s123_s14, %s123_s14 }
  0x2b   :  { %p206_p2 = scmp.ne.s32.totalorder %s123_s14, %s205_s15  ;;  %p211_p4 = scmp.lt.s32.totalorder %s205_s15, %s205_s15 }
  0x2d   :  { %145 = vmatpush3.bf16.msra.mxu0 %v160_v2  ;;  %p212_p5 = por %p211_p4, %p210_p3 }
  0x2f   :  { %p213_p6 = pnand %p212_p5, %p206_p2 }
  0x30   :  { %147 = vmatmul.mubr.msk.bf16.vlgmr.msra.gmra.mrb[0].mxu0 %vm70_vm1, %v46_v5 }
 0x103   :  { %v108_v7 = vpop.f32.mrb[0].mxu0 }
 0x104   :  { %v109_v8 = vadd.f32 %v135_v6, %v108_v7  ;;  %v148_v9 = vpop.f32.mrb[1].mxu0 }
 0x105   :  { %v111_v10 = vpop.f32.mrb[2].mxu0 }
 0x106   :  { %115 = vst [vmem:[#allocation7] sm:$0xff] %v109_v8  ;;  %v112_v11 = vadd.f32 %v135_v6, %v111_v10  ;;  %v149_v12 = vpop.f32.mrb[3].mxu0 }
 0x108   :  { %116 = vst [vmem:[#allocation7 + $0x8] sm:$0xff] %v112_v11 }
 0x109   :  { %216 = shalt.err (!%p213_p6)
}
 0x10a   :  { %s217_s17 = scalar_lea.hbm %s310_s3, 256 }
 0x10b   :  { %p218_p7 = scmp.ne.s32.totalorder %s310_s3, %s217_s17  ;;  %p221_p8 = scmp.lt.u32.totalorder %s217_s17, %s310_s3 }
 0x10d   :  { %p223_p9 = pnand %p221_p8, %p218_p7 }
 0x10f   :  { %226 = shalt.err (!%p223_p9)
}
 0x110   :  { %128 = dma.vmem_to_hbm [thread:$0]  %s123_s14, 256, %s310_s3, [#allocation4], %s234_s22, %s234_s22, %s235_s23  }
 0x111   :  { %231 = dma.done.wait [#allocation4], 256  }
 0x112   :  { %232 = vsyncadd [#allocation4], 4294967040 }
 0x113   :  { %132 = vsyncpa [#allocation3], 1 }
 0x114   :  { %133 = vsyncpa [#allocation6], 1 }
 0x115   :  { %134 = vsyncpa [#allocation4], 1 }

</bundles_post_ra>
